<compile_context>
chip_gen: v7x
topology: tpu7x:2x2x1
jax: 0.10.0
libtpu: 0.0.40
codegen_flags: <defaults>
</compile_context>

<pallas_src>
import functools

import jax
import jax.numpy as jnp
from jax import lax
from jax.experimental import pallas as pl
from jax.experimental.pallas import tpu as pltpu

NUM_CHANNELS = 6  # 4 index + 1 time + 1 vector channel


# ---------------------------------------------------------------------------
# Tile pickers
# ---------------------------------------------------------------------------
def _pick_seq_tile(L):
    # Kernel-1 sequence tile: biggest multiple-of-16 tile that divides L.
    for t in (512, 256, 128, 64, 32, 16):
        if L % t == 0:
            return t
    return L  # small-L fallback (block == full dim is always legal)


def _pick_row_tile(L):
    # Row tile of the pairwise image.  Multiple of 16 preferred (bf16 sublane
    # pairs, aligned dynamic slices of the E slab); kept <= 128 so the
    # per-chunk [TM, TN] working arrays stay a few hundred KiB.
    for t in (128, 64, 32, 16):
        if L % t == 0:
            return t
    return L


def _pick_col_tile(L):
    # Column chunk: lane-dim multiple of 128 so chunked acc stores are
    # unmasked and lane-aligned.
    for t in (512, 256, 128):
        if L % t == 0:
            return t
    return L


# ---------------------------------------------------------------------------
# Kernel 1: EventEmb.get_eventemb (use_time=True), gridded over (B, L/TL).
#   E = gathered_sum + cos((ts[:, -1] - ts) * basis_freq + phase)
# gathered_sum = (nemb+nfeat)[s] + (nemb+nfeat)[o] + efeat[e] is produced by a
# single fused XLA gather+add in glue (one [B,L,H] slab instead of three).
# Output is bf16: E is only ever consumed as the bf16 MXU operand in kernel 2.
# ---------------------------------------------------------------------------
def _event_emb_kernel(gsum_ref, tsd_ref, bf_ref, ph_ref, out_ref):
    # gsum: [1, TL, H] f32; tsd: [1, TL, 1] f32; bf/ph: [1, 1, H] f32
    harmonic = jnp.cos(tsd_ref[0] * bf_ref[0] + ph_ref[0])       # [TL, H]
    out_ref[0] = (gsum_ref[0] + harmonic).astype(out_ref.dtype)  # bf16


def event_emb_pallas(gsum, tsd, bf, ph):
    B, L, H = gsum.shape
    TL = _pick_seq_tile(L)
    assert L % TL == 0
    return pl.pallas_call(
        _event_emb_kernel,
        out_shape=jax.ShapeDtypeStruct((B, L, H), jnp.bfloat16),
        grid=(B, L // TL),
        in_specs=[
            pl.BlockSpec((1, TL, H), lambda b, i: (b, i, 0)),
            pl.BlockSpec((1, TL, 1), lambda b, i: (b, i, 0)),
            pl.BlockSpec((1, 1, H), lambda b, i: (0, 0, 0)),
            pl.BlockSpec((1, 1, H), lambda b, i: (0, 0, 0)),
        ],
        out_specs=pl.BlockSpec((1, TL, H), lambda b, i: (b, i, 0)),
        compiler_params=pltpu.CompilerParams(
            dimension_semantics=("parallel", "parallel")),
    )(gsum, tsd, bf, ph)


# ---------------------------------------------------------------------------
# Kernel 2: fused pairwise image + 1x1 conv + ReLU + GAP + linear classifier.
# Grid = (B, L // TM): batch axis parallel (outer), row-tile axis is the GAP
# accumulation axis (arbitrary, inner/last).  The [6, TM, TN] image chunk only
# ever lives in VMEM/vregs.
#
# NOTE: correctness relies on the batch axis being the OUTER grid axis so that
# acc_ref is zeroed at i == 0 and finalized at i == n_tiles - 1 of each batch.
# ---------------------------------------------------------------------------
def _fused_image_cnn_kernel(col_tile, efull_ref, srow_ref, orow_ref, trow_ref,
                            scol_ref, ocol_ref, tcol_ref,
                            w1_ref, b1_ref, w2t_ref, b2_ref,
                            out_ref, acc_ref):
    i = pl.program_id(1)
    n_tiles = pl.num_programs(1)
    f32 = jnp.float32
    c1_dim = acc_ref.shape[0]
    l_full = acc_ref.shape[1]
    row_tile = srow_ref.shape[1]

    @pl.when(i == 0)
    def _init():
        acc_ref[...] = jnp.zeros_like(acc_ref)

    # Row tile of E sliced out of the per-batch-resident [L, H] bf16 slab
    # (no separate row DMA stream; offset is tile-aligned).
    row_start = pl.multiple_of(i * row_tile, row_tile)
    e_rows = efull_ref[0, pl.ds(row_start, row_tile), :]         # [TM, H] bf16

    s_r = srow_ref[0]                                            # [TM, 1] int32
    o_r = orow_ref[0]
    t_r = trow_ref[0]                                            # [TM, 1] f32

    # Hoist the 1x1-conv scalars (SMEM reads) out of the column-chunk loop.
    w1_s = [[w1_ref[c1, c] for c in range(NUM_CHANNELS)] for c1 in range(c1_dim)]
    b1_s = [b1_ref[c1] for c1 in range(c1_dim)]

    # Static column-chunk loop: bounds the per-channel working set to [TM, TN].
    n_chunks = l_full // col_tile
    for j in range(n_chunks):
        cs = j * col_tile
        e_cols = efull_ref[0, cs:cs + col_tile, :]               # [TN, H] bf16
        # Vector channel: E_rows @ E_cols^T on the MXU (bf16 in, f32 acc).
        ch_dot = lax.dot_general(e_rows, e_cols, (((1,), (1,)), ((), ())),
                                 preferred_element_type=f32)     # [TM, TN]
        s_c = scol_ref[0, :, cs:cs + col_tile]                   # [1, TN] int32
        o_c = ocol_ref[0, :, cs:cs + col_tile]
        t_c = tcol_ref[0, :, cs:cs + col_tile]                   # [1, TN] f32

        ch = (
            (s_r == s_c).astype(f32),   # IndexOperator channels (VPU)
            (s_r == o_c).astype(f32),
            (o_r == s_c).astype(f32),
            (o_r == o_c).astype(f32),
            t_r - t_c,                  # TimeOperator channel (VPU)
            ch_dot,                     # VectorOperator channel (MXU)
        )

        # 1x1 conv (6 scalar-broadcast FMAs per output channel) + ReLU +
        # partial GAP (row reduce).  Row-sums are collected and written with
        # ONE full-sublane, lane-aligned accumulator update per chunk.
        rows = []
        for c1 in range(c1_dim):
            h = b1_s[c1] + w1_s[c1][0] * ch[0]
            for c in range(1, NUM_CHANNELS):
                h = h + w1_s[c1][c] * ch[c]
            h = jnp.maximum(h, 0.0)                              # [TM, TN]
            rows.append(jnp.sum(h, axis=0, keepdims=True))       # [1, TN]
        psum = jnp.concatenate(rows, axis=0)                     # [C1, TN]
        acc_ref[:, cs:cs + col_tile] = acc_ref[:, cs:cs + col_tile] + psum

    # Finalize: GAP normalize + tiny linear classifier (exact f32 on the VPU:
    # broadcast-multiply against the transposed [C1, K] weight + sublane sum).
    @pl.when(i == n_tiles - 1)
    def _finish():
        pooled = jnp.sum(acc_ref[...], axis=1, keepdims=True) * (
            1.0 / float(l_full * l_full))                        # [C1, 1]
        logits = jnp.sum(w2t_ref[...] * pooled, axis=0,
                         keepdims=True) + b2_ref[...]            # [1, K]
        out_ref[0] = logits


def fused_image_cnn_pallas(E, s_rows, o_rows, t_rows, s_cols, o_cols, t_cols,
                           w1, b1, w2t, b2, *, row_tile, col_tile):
    B, L, H = E.shape
    C1 = w1.shape[0]
    K = w2t.shape[1]
    assert L % row_tile == 0 and L % col_tile == 0
    n_tiles = L // row_tile

    row_map = lambda b, i: (b, i, 0)   # per-row-tile blocks
    full_map = lambda b, i: (b, 0, 0)  # per-batch-resident blocks (DMA'd once/batch)

    in_specs = [
        pl.BlockSpec((1, L, H), full_map),                      # E slab (bf16)
        pl.BlockSpec((1, row_tile, 1), row_map),                # sids rows
        pl.BlockSpec((1, row_tile, 1), row_map),                # oids rows
        pl.BlockSpec((1, row_tile, 1), row_map),                # ts rows
        pl.BlockSpec((1, 1, L), full_map),                      # sids cols
        pl.BlockSpec((1, 1, L), full_map),                      # oids cols
        pl.BlockSpec((1, 1, L), full_map),                      # ts cols
        pl.BlockSpec(memory_space=pltpu.MemorySpace.SMEM),      # w1 (scalars)
        pl.BlockSpec(memory_space=pltpu.MemorySpace.SMEM),      # b1 (scalars)
        pl.BlockSpec((C1, K), lambda b, i: (0, 0)),             # w2^T
        pl.BlockSpec((1, K), lambda b, i: (0, 0)),              # b2
    ]

    kernel = functools.partial(_fused_image_cnn_kernel, col_tile)

    return pl.pallas_call(
        kernel,
        out_shape=jax.ShapeDtypeStruct((B, 1, K), jnp.float32),
        grid=(B, n_tiles),
        in_specs=in_specs,
        out_specs=pl.BlockSpec((1, 1, K), lambda b, i: (b, 0, 0)),
        scratch_shapes=[pltpu.VMEM((C1, L), jnp.float32)],
        compiler_params=pltpu.CompilerParams(
            dimension_semantics=("parallel", "arbitrary"),
            # <= 48 MiB: v7x has only 64 MiB physical VMEM per TensorCore.
            vmem_limit_bytes=48 * 1024 * 1024),
    )(E, s_rows, o_rows, t_rows, s_cols, o_cols, t_cols, w1, b1, w2t, b2)


# ---------------------------------------------------------------------------
# Full TGACN forward (glue: gathers, reshapes, parameter plumbing)
# ---------------------------------------------------------------------------
def tgacn_forward(params, sids, oids, eids, ts):
    B, L = sids.shape
    H = params["nfeat"].shape[1]
    sids = sids.astype(jnp.int32)
    oids = oids.astype(jnp.int32)
    eids = eids.astype(jnp.int32)
    ts = ts.astype(jnp.float32)

    # Embedding gathers (glue).  nemb and nfeat are always indexed by the same
    # ids -> fold into one table; the three gathers + adds fuse into a single
    # XLA op producing ONE [B, L, H] slab for kernel 1.
    node_tab = params["nemb"] + params["nfeat"]
    gsum = node_tab[sids] + node_tab[oids] + params["efeat"][eids]  # [B, L, H]
    tsd = (ts[:, -1:] - ts)[:, :, None]                             # [B, L, 1]
    bf = params["basis_freq"].reshape(1, 1, H)
    ph = params["phase"].reshape(1, 1, H)

    E = event_emb_pallas(gsum, tsd, bf, ph)                         # [B, L, H] bf16

    out = fused_image_cnn_pallas(
        E,
        sids[:, :, None], oids[:, :, None], ts[:, :, None],         # row views
        sids[:, None, :], oids[:, None, :], ts[:, None, :],         # col views
        params["w1"], params["b1"],
        params["w2"].T, params["b2"][None, :],                      # lane-dense head
        row_tile=_pick_row_tile(L), col_tile=_pick_col_tile(L))
    return out[:, 0, :]                                             # [B, K]


# Pure-JAX reference of the same forward pass (for correctness check).
def reference_forward(params, sids, oids, eids, ts, *, bf16_dot):
    HI = lax.Precision.HIGHEST
    ts = ts.astype(jnp.float32)
    tsd = ts[:, -1:] - ts
    harmonic = jnp.cos(tsd[:, :, None] * params["basis_freq"][None, None, :]
                       + params["phase"][None, None, :])
    E = (params["nemb"][sids] + params["nemb"][oids]
         + params["nfeat"][sids] + params["nfeat"][oids]
         + params["efeat"][eids] + harmonic)
    f32 = jnp.float32
    ss = (sids[:, :, None] == sids[:, None, :]).astype(f32)
    so = (sids[:, :, None] == oids[:, None, :]).astype(f32)
    os_ = (oids[:, :, None] == sids[:, None, :]).astype(f32)
    oo = (oids[:, :, None] == oids[:, None, :]).astype(f32)
    td = ts[:, :, None] - ts[:, None, :]
    Ed = E.astype(jnp.bfloat16) if bf16_dot else E
    dot = jnp.einsum("bih,bjh->bij", Ed, Ed,
                     preferred_element_type=f32, precision=HI)
    image = jnp.stack([ss, so, os_, oo, td, dot], axis=1)           # [B, 6, L, L]
    B, C, L, _ = image.shape
    flat = image.reshape(B, C, L * L)
    h = jnp.einsum("oc,bcl->bol", params["w1"], flat, precision=HI)
    h = jnp.maximum(h + params["b1"][None, :, None], 0.0)
    pooled = h.mean(axis=-1)                                        # [B, C1]
    return jnp.einsum("ko,bo->bk", params["w2"], pooled,
                      precision=HI) + params["b2"][None, :]


if __name__ == "__main__":
    B, L, H = 2, 8, 32
    NUM_NODES, NUM_EDGES, C1, CLASS_NUM = 16, 16, 16, 4

    key = jax.random.PRNGKey(0)
    keys = jax.random.split(key, 12)
    bound = 1.0 / float(jnp.sqrt(H))

    params = {
        # use_timee=True -> nemb zero-initialized (trainable) per EventEmb.__init__
        "nemb": jnp.zeros((NUM_NODES, H), jnp.float32),
        "nfeat": jax.random.uniform(keys[0], (NUM_NODES, H), jnp.float32,
                                    -bound, bound).at[0].set(0.0),   # padding_idx=0
        "efeat": jax.random.uniform(keys[1], (NUM_EDGES, H), jnp.float32,
                                    -bound, bound).at[0].set(0.0),   # padding_idx=0
        "basis_freq": jax.random.uniform(keys[2], (H,), jnp.float32, -bound, bound),
        "phase": jax.random.uniform(keys[3], (H,), jnp.float32, -bound, bound),
        "w1": jax.random.uniform(keys[4], (C1, NUM_CHANNELS), jnp.float32, -0.3, 0.3),
        "b1": jax.random.uniform(keys[5], (C1,), jnp.float32, -0.1, 0.1),
        "w2": jax.random.uniform(keys[6], (CLASS_NUM, C1), jnp.float32, -0.3, 0.3),
        "b2": jax.random.uniform(keys[7], (CLASS_NUM,), jnp.float32, -0.1, 0.1),
    }

    sids = jax.random.randint(keys[8], (B, L), 1, NUM_NODES, jnp.int32)
    oids = jax.random.randint(keys[9], (B, L), 1, NUM_NODES, jnp.int32)
    eids = jax.random.randint(keys[10], (B, L), 1, NUM_EDGES, jnp.int32)
    ts = jnp.sort(jax.random.uniform(keys[11], (B, L), jnp.float32, 0.0, 2.0), axis=1)

    out = tgacn_forward(params, sids, oids, eids, ts)
    out = jax.block_until_ready(out)
    assert out.shape == (B, CLASS_NUM), out.shape

    # Tight check: reference using the same bf16-operand / f32-accumulation
    # convention for the E@E^T channel (matches the kernel's MXU precision).
    ref_bf16 = reference_forward(params, sids, oids, eids, ts, bf16_dot=True)
    if not bool(jnp.allclose(out, ref_bf16, atol=5e-3, rtol=5e-3)):
        raise AssertionError(f"mismatch vs bf16-matmul reference:\n{out}\nvs\n{ref_bf16}")

    # Loose check: fully-f32 reference (bf16 MXU rounding is the only delta).
    ref_f32 = reference_forward(params, sids, oids, eids, ts, bf16_dot=False)
    if not bool(jnp.allclose(out, ref_f32, atol=5e-2, rtol=5e-2)):
        raise AssertionError(f"mismatch vs f32 reference:\n{out}\nvs\n{ref_f32}")

    print("KERNEL_OK")
</pallas_src>

<mosaic_0001>
module attributes {stable_mosaic.version = 11 : i64} {
  func.func @_event_emb_kernel(%arg0: i32, %arg1: i32, %arg2: memref<1x8x32xf32, #tpu.memory_space<vmem>>, %arg3: memref<1x8x1xf32, #tpu.memory_space<vmem>>, %arg4: memref<1x1x32xf32, #tpu.memory_space<vmem>>, %arg5: memref<1x1x32xf32, #tpu.memory_space<vmem>>, %arg6: memref<1x8x32xbf16, #tpu.memory_space<vmem>>) attributes {dimension_semantics = [#tpu.dimension_semantics<parallel>, #tpu.dimension_semantics<parallel>], iteration_bounds = array<i64: 2, 1>, scalar_prefetch = 0 : i64, scratch_operands = 0 : i64, tpu.core_type = #tpu.core_type<tc>, window_params = [{transform_indices = @transform_0, window_bounds = array<i64: 1, 8, 32>}, {transform_indices = @transform_1, window_bounds = array<i64: 1, 8, 1>}, {pipeline_mode = #tpu.pipeline_mode<synchronous>, transform_indices = @transform_2, window_bounds = array<i64: 1, 1, 32>}, {pipeline_mode = #tpu.pipeline_mode<synchronous>, transform_indices = @transform_3, window_bounds = array<i64: 1, 1, 32>}, {transform_indices = @transform_4, window_bounds = array<i64: 1, 8, 32>}]} {
    %c0 = arith.constant 0 : index
    %c0_0 = arith.constant 0 : index
    %c0_1 = arith.constant 0 : index
    %0 = vector.load %arg3[%c0, %c0_0, %c0_1] : memref<1x8x1xf32, #tpu.memory_space<vmem>>, vector<1x8x1xf32>
    %1 = vector.shape_cast %0 : vector<1x8x1xf32> to vector<8x1xf32>
    %c0_2 = arith.constant 0 : index
    %c0_3 = arith.constant 0 : index
    %c0_4 = arith.constant 0 : index
    %2 = vector.load %arg4[%c0_2, %c0_3, %c0_4] : memref<1x1x32xf32, #tpu.memory_space<vmem>>, vector<1x1x32xf32>
    %3 = vector.shape_cast %2 : vector<1x1x32xf32> to vector<1x32xf32>
    %4 = vector.broadcast %1 : vector<8x1xf32> to vector<8x32xf32>
    %5 = vector.broadcast %3 : vector<1x32xf32> to vector<8x32xf32>
    %6 = arith.mulf %4, %5 : vector<8x32xf32>
    %c0_5 = arith.constant 0 : index
    %c0_6 = arith.constant 0 : index
    %c0_7 = arith.constant 0 : index
    %7 = vector.load %arg5[%c0_5, %c0_6, %c0_7] : memref<1x1x32xf32, #tpu.memory_space<vmem>>, vector<1x1x32xf32>
    %8 = vector.shape_cast %7 : vector<1x1x32xf32> to vector<1x32xf32>
    %9 = vector.broadcast %8 : vector<1x32xf32> to vector<8x32xf32>
    %10 = arith.addf %6, %9 : vector<8x32xf32>
    %11 = math.cos %10 : vector<8x32xf32>
    %c0_8 = arith.constant 0 : index
    %c0_9 = arith.constant 0 : index
    %c0_10 = arith.constant 0 : index
    %12 = vector.load %arg2[%c0_8, %c0_9, %c0_10] : memref<1x8x32xf32, #tpu.memory_space<vmem>>, vector<1x8x32xf32>
    %13 = vector.shape_cast %12 : vector<1x8x32xf32> to vector<8x32xf32>
    %14 = arith.addf %13, %11 : vector<8x32xf32>
    %15 = arith.truncf %14 : vector<8x32xf32> to vector<8x32xbf16>
    %c0_11 = arith.constant 0 : index
    %c0_12 = arith.constant 0 : index
    %c0_13 = arith.constant 0 : index
    %16 = vector.load %arg6[%c0_11, %c0_12, %c0_13] : memref<1x8x32xbf16, #tpu.memory_space<vmem>>, vector<1x8x32xbf16>
    %17 = vector.shape_cast %16 : vector<1x8x32xbf16> to vector<8x32xbf16>
    %18 = vector.shape_cast %15 : vector<8x32xbf16> to vector<1x8x32xbf16>
    tpu.vector_store %arg6[%c0_11, %c0_12, %c0_13], %18 {strides = array<i32>} : memref<1x8x32xbf16, #tpu.memory_space<vmem>>, vector<1x8x32xbf16>,
    return
  }
  func.func @transform_0(%arg0: i32, %arg1: i32) -> (i32, i32, i32) {
    %c0_i32 = arith.constant 0 : i32
    %c0_i32_0 = arith.constant 0 : i32
    return %arg0, %arg1, %c0_i32 : i32, i32, i32
  }
  func.func @transform_1(%arg0: i32, %arg1: i32) -> (i32, i32, i32) {
    %c0_i32 = arith.constant 0 : i32
    %c0_i32_0 = arith.constant 0 : i32
    return %arg0, %arg1, %c0_i32 : i32, i32, i32
  }
  func.func @transform_2(%arg0: i32, %arg1: i32) -> (i32, i32, i32) {
    %c0_i32 = arith.constant 0 : i32
    %c0_i32_0 = arith.constant 0 : i32
    %c0_i32_1 = arith.constant 0 : i32
    %c0_i32_2 = arith.constant 0 : i32
    return %c0_i32, %c0_i32_0, %c0_i32_1 : i32, i32, i32
  }
  func.func @transform_3(%arg0: i32, %arg1: i32) -> (i32, i32, i32) {
    %c0_i32 = arith.constant 0 : i32
    %c0_i32_0 = arith.constant 0 : i32
    %c0_i32_1 = arith.constant 0 : i32
    %c0_i32_2 = arith.constant 0 : i32
    return %c0_i32, %c0_i32_0, %c0_i32_1 : i32, i32, i32
  }
  func.func @transform_4(%arg0: i32, %arg1: i32) -> (i32, i32, i32) {
    %c0_i32 = arith.constant 0 : i32
    %c0_i32_0 = arith.constant 0 : i32
    return %arg0, %arg1, %c0_i32 : i32, i32, i32
  }
}

</mosaic_0001>

<bundles_post_ra>
// kernel: tpu_custom_call.1
= control target key start
LH: loop header
LB: loop body
LE: loop exit
PB: predicated region body
PF: predicated region fallthrough
CT: control target
= control target key end

     0   :  { %9 = vsyncpa [#allocation3], 0  ;;  %s828_s0 = inlined_call_operand.vmem [shape: f32[2,8,32], index: 0, kind: input, shape index: {}]   ;;  %s829_s1 = inlined_call_operand.vmem [shape: f32[2,8,1], index: 1, kind: input, shape index: {}]   ;;  %s830_s2 = inlined_call_operand.vmem [shape: f32[1,1,32], index: 2, kind: input, shape index: {}]   ;;  %s831_s3 = inlined_call_operand.vmem [shape: f32[1,1,32], index: 3, kind: input, shape index: {}]   ;;  %s832_s4 = inlined_call_operand.hbm [shape: bf16[2,8,32], index: 4, kind: output, shape index: {}]  }
   0x1   :  { %11 = vsyncpa [#allocation3 + $0x1], 0  ;;  %s679_s15 = smov 0   ;;  %s681_s16 = smov 0  }
   0x2   :  { %s683_s17 = smov 0   ;;  %s685_s18 = smov 0  }
   0x3   :  { %s687_s19 = smov 0   ;;  %s689_s20 = smov 0  }
   0x4 LB: > { %s477_s21 = sadd.s32 4294967295, %s644_s20   ;;  %s478_s22 = sadd.s32 4294967294, %s644_s20   ;;  %s644_s20 = sphi %s689_s20, %s17_s20   ;;  %s640_s19 = sphi %s687_s19, %s839_s19   ;;  %s636_s18 = sphi %s685_s18, %s838_s18   ;;  %s632_s17 = sphi %s683_s17, %s837_s17   ;;  %s628_s16 = sphi %s681_s16, %s836_s16   ;;  %s624_s15 = sphi %s679_s15, %s835_s15  }
   0x5   : > { %s29_s23 = sadd.s32 1, %s640_s19  ;;  %s136_s24 = sadd.s32 1, %s632_s17 }
   0x6   : > { %p31_p0 = scmp.ge.s32.totalorder %s29_s23, 2  ;;  %p146_p1 = scmp.ne.s32.totalorder %s632_s17, %s628_s16 }
   0x7   : > { %p147_p2 = scmp.eq.s32.totalorder %s477_s21, 1  ;;  %p152_p3 = scmp.ne.s32.totalorder %s628_s16, %s624_s15 }
   0x8   : > { %s841_s23 = smov (%p31_p0, %s29_s23), 0  ;;  %p153_p5 = scmp.eq.s32.totalorder %s478_s22, 1 }
   0x9   : > { %p719_p4 = por %p147_p2, %p146_p1  ;;  %s131_s26 = ssub.s32 %s640_s19, %s841_s23 }
   0xa   : > { %p481_p6 = scmp.ge.s32.totalorder %s644_s20, 1  ;;  %p134_p7 = scmp.eq.s32.totalorder %s131_s26, 0 }
   0xb   : > { %p726_p8 = por %p153_p5, %p152_p3  ;;  %p197_p9 = scmp.lt.s32.totalorder %s644_s20, 3 }
   0xc   : > { %s732_s28 = scalar_select %p134_p7, %s632_s17, %s136_s24  }
   0xd   : > { %p198_p10 = pnand %p481_p6, %p197_p9 }
   0xe   : > { %p232_p11 = scmp.lt.s32.totalorder (!%p198_p10), %s636_s18, 1  ;;  %v646_v0 = vmov (!%p198_p10), 0   ;;  %v485_v2 = vld [vmem:[%s830_s2] ss:$0 sm:$0xff] (!%p198_p10)  ;;  %v647_v17 = vmov (!%p198_p10), 683565275  }
   0xf   : > { %201 = sbr.rel (%p198_p10) target bundleno = 256 (0x100), region = 36  ;;  %561 = vset.pattern.permute.xlu0 (!%p198_p10), %v646_v0  ;;  %v486_v3 = vld [vmem:[%s831_s3] ss:$0 sm:$0xff] (!%p198_p10)  ;;  %v648_v19 = vmov (!%p198_p10), 2475754826   ;;  %s229_s12 = sand.u32 (!%p198_p10), 1, %s628_s16  }
  0x10   : > { %v649_v22 = vmov (!%p198_p10), 2131351028   ;;  %v650_v25 = vmov (!%p198_p10), 2102212464   ;;  %v651_v28 = vmov (!%p198_p10), 920167782  }
  0x11   : > { %v652_v31 = vmov (!%p198_p10), 1326507024   ;;  %s482_s13 = sshll.u32 (!%p198_p10), %s229_s12, 2  ;;  %s492_s24 = sshll.u32 (!%p198_p10), %s636_s18, 6  ;;  %vm374_vm13 = vcmask (!%p198_p10), 257024  }
  0x12   : > { %s231_s26 = scalar_lea.vmem (!%p198_p10), [#allocation2], %s482_s13  ;;  %s781_s6 = scalar_lea.hbm (!%p198_p10), %s832_s4, %s492_s24 }
  0x16   : > { %s736_s29 = scalar_select %p232_p11, %s636_s18, 1 }
  0x17   : > { %s653_s18 = smov [#allocation2]  }
  0x18   : > { %s483_s30 = sshll.u32 %s736_s29, 3  ;;  %s391_s29 = sshll.u32 %s231_s26, 4  ;;  %s783_s29 = int_to_ptr.vmem [resolvable:$true] %s391_s29 }
  0x19   : > { %s245_s7 = scalar_lea.vmem %s829_s1, %s483_s30  ;;  %s238_s22 = scalar_lea.vmem %s828_s0, %s483_s30 }
  0x1a   : > { %v246_v1 = vld [vmem:[%s245_s7] sm:$0xff]  ;;  %s377_s7 = scalar_lea.sflag [#allocation3], %s229_s12  ;;  %s566_s8 = scalar_lea.vmem %s783_s29, 64 }
  0x1b   : > { %250 = vperm.xlu0 %561, %v246_v1   ;;  %p567_p12 = scmp.ne.s32.totalorder %s783_s29, %s566_s8  ;;  %s570_s9 = sshll.u32 %s653_s18, 4  ;;  %s571_s9 = int_to_ptr.vmem [resolvable:$false] %s570_s9 }
  0x1c   : > { %s572_s10 = scalar_lea.vmem %s571_s9, 128  ;;  %p573_p1 = scmp.lt.s32.totalorder %s783_s29, %s571_s9 }
  0x1d   : > { %p568_p13 = pnand %p567_p12, %p719_p4  ;;  %p574_p2 = scmp.lt.s32.totalorder %s572_s10, %s566_s8 }
  0x1f   : > { %p569_p0 = pneg %p568_p13  ;;  %p575_p3 = por %p574_p2, %p573_p1 }
  0x21   : > { %p576_p5 = pnand %p575_p3, %p569_p0 }
  0x9a   : > { %v251_v4 = vpop.permute.xlu0 %250 }
  0x9b   : > { %v259_v5 = vmul.f32 %v485_v2, %v251_v4 }
  0x9d   : > { %v750_v6 = vadd.f32 %v486_v3, %v259_v5 }
  0x9f   : > { %v271_v7 = vand.u32 2139095040, %v750_v6  ;;  %v268_v11 = vand.u32 2147483647, %v750_v6  ;;  %vm270_vm7 = vcmp.lt.s32.totalorder %v750_v6, 0  ;;  %vm360_vm12 = vweird.f32 %v750_v6 }
  0xa1   : > { %v272_v8 = vshrl.u32 %v271_v7, 23  ;;  %v275_v14 = vand.u32 8388607, %v268_v11  ;;  %vm269_vm8 = vcmp.le.f32.partialorder %v268_v11, 0.7853982 }
  0xa3   : > { %v487_v9 = vadd.s32 4294967169, %v272_v8  ;;  %v276_v33 = vor.u32 8388608, %v275_v14 }
  0xa5   : > { %v278_v10 = vadd.s32 1, %v487_v9  ;;  %v316_v47 = vshll.u32 %v276_v33, 8 }
  0xa7   : > { %vm279_vm0 = vcmp.gt.s32.totalorder %v278_v10, 0 }
  0xa8   : > { %v280_v12 = vsel %vm279_vm0, %v278_v10, 0 }
  0xa9   : > { %v282_v13 = vand.u32 31, %v280_v12  ;;  %v281_v16 = vshrl.u32 %v280_v12, 5 }
  0xab   : > { %v283_v15 = vsub.s32 32, %v282_v13  ;;  %v285_v18 = vshll.u32 %v647_v17, %v282_v13  ;;  %v288_v20 = vshll.u32 %v648_v19, %v282_v13  ;;  %v291_v24 = vshll.u32 %v649_v22, %v282_v13 }
  0xac   : > { %v294_v27 = vshll.u32 %v650_v25, %v282_v13  ;;  %v297_v30 = vshll.u32 %v651_v28, %v282_v13  ;;  %vm300_vm1 = vcmp.lt.s32.totalorder %v281_v16, 1  ;;  %vm303_vm2 = vcmp.lt.s32.totalorder %v281_v16, 4 }
  0xad   : > { %v286_v21 = vshrl.u32 %v648_v19, %v283_v15  ;;  %v289_v23 = vshrl.u32 %v649_v22, %v283_v15  ;;  %v292_v26 = vshrl.u32 %v650_v25, %v283_v15  ;;  %v295_v29 = vshrl.u32 %v651_v28, %v283_v15 }
  0xae   : > { %v298_v32 = vshrl.u32 %v652_v31, %v283_v15  ;;  %v284_v42 = vshrl.u32 %v647_v17, %v283_v15  ;;  %vm302_vm3 = vcmp.lt.s32.totalorder %v281_v16, 3  ;;  %vm301_vm4 = vcmp.lt.s32.totalorder %v281_v16, 2  ;;  %v371_v31 = vld [vmem:[%s238_s22] sm:$0xff] }
  0xaf   : > { %v287_v34 = vor.u32 %v286_v21, %v285_v18  ;;  %v290_v35 = vor.u32 %v289_v23, %v288_v20  ;;  %v293_v36 = vor.u32 %v292_v26, %v291_v24  ;;  %v296_v37 = vor.u32 %v295_v29, %v294_v27 }
  0xb0   : > { %v299_v38 = vor.u32 %v298_v32, %v297_v30 }
  0xb1   : > { %v305_v39 = vsel %vm303_vm2, %v293_v36, 2102212464  ;;  %v308_v40 = vsel %vm300_vm1, %v287_v34, %v290_v35  ;;  %v312_v41 = vsel %vm300_vm1, %v290_v35, %v293_v36  ;;  %v309_v43 = vsel %vm303_vm2, %v296_v37, 920167782 }
  0xb2   : > { %v313_v44 = vsel %vm303_vm2, %v299_v38, 1326507024  ;;  %v310_v45 = vsel %vm302_vm3, %v293_v36, %v309_v43  ;;  %v304_v48 = vsel %vm300_vm1, %v284_v42, %v287_v34  ;;  %v306_v49 = vsel %vm302_vm3, %v290_v35, %v305_v39 }
  0xb3   : > { %v314_v46 = vsel %vm302_vm3, %v296_v37, %v313_v44  ;;  %v311_v50 = vsel %vm301_vm4, %v308_v40, %v310_v45  ;;  %v307_v56 = vsel %vm301_vm4, %v304_v48, %v306_v49 }
  0xb4   : > { %v315_v51 = vsel %vm301_vm4, %v312_v41, %v314_v46  ;;  %v759_v54 = vmul.u32.u64.low %v316_v47, %v311_v50  ;;  %v760_v55 = vmul.u32.u64.high %v316_v47, %v311_v50, %v759_v54  ;;  %v323_v58 = vmul.u32 %v316_v47, %v307_v56 }
  0xb5   : > { %v756_v52 = vmul.u32.u64.low %v316_v47, %v315_v51  ;;  %v757_v53 = vmul.u32.u64.high %v316_v47, %v315_v51, %v756_v52 }
  0xb6   : > { %v326_v57 = vadd.s32 1, %v760_v55 }
  0xb7   : > { %vm325_vm5 = vc.u32 %v757_v53, %v759_v54  ;;  %v324_v7 = vadd.s32 %v759_v54, %v757_v53 }
  0xb8   : > { %v327_v59 = vsel %vm325_vm5, %v326_v57, %v760_v55 }
  0xb9   : > { %v328_v60 = vadd.s32 %v327_v59, %v323_v58 }
  0xbb   : > { %v329_v61 = vadd.s32 536870912, %v328_v60 }
  0xbd   : > { %v330_v62 = vshrl.u32 %v329_v61, 30 }
  0xbf   : > { %v331_v63 = vshll.u32 %v330_v62, 30  ;;  %v354_v22 = vsub.s32 4, %v330_v62 }
  0xc1   : > { %v332_v0 = vsub.s32 %v328_v60, %v331_v63  ;;  %v355_v24 = vsel %vm270_vm7, %v354_v22, %v330_v62 }
  0xc2   : > { %v357_v25 = vsel %vm269_vm8, 0, %v355_v24 }
  0xc3   : > { %v334_v1 = vsub.s32 0, %v332_v0  ;;  %v361_v26 = vand.u32 3, %v357_v25 }
  0xc5   : > { %v488_v2 = vmin.u32 %v334_v1, %v332_v0  ;;  %vm366_vm9 = vcmp.eq.s32.totalorder %v361_v26, 2  ;;  %vm363_vm10 = vcmp.eq.s32.totalorder %v361_v26, 0  ;;  %vm362_vm11 = vcmp.lt.s32.totalorder %v361_v26, 2 }
  0xc7   : > { %v336_v3 = vclz %v488_v2 }
  0xc9   : > { %v489_v4 = vadd.s32 4294967294, %v336_v3 }
  0xcb   : > { %vm490_vm6 = vcmp.lt.s32.totalorder %v489_v4, 0 }
  0xcc   : > { %v339_v5 = vsel %vm490_vm6, 0, %v489_v4 }
  0xcd   : > { %v340_v8 = vsub.s32 32, %v339_v5  ;;  %v344_v9 = vsub.s32 4294967266, %v339_v5  ;;  %v341_v10 = vshll.u32 %v332_v0, %v339_v5 }
  0xcf   : > { %v342_v12 = vshrl.u32 %v324_v7, %v340_v8  ;;  %v345_v13 = vadd.s32 127, %v344_v9 }
  0xd1   : > { %v343_v14 = vor.u32 %v342_v12, %v341_v10  ;;  %v346_v15 = vshll.u32 %v345_v13, 23 }
  0xd3   : > { %v347_v16 = vor.u32 4788187, %v346_v15  ;;  %v350_v18 = vcvt.s32.f32 %v343_v14 }
  0xd5   : > { %v348_v17 = vand.u32 2147483647, %v347_v16 }
  0xd7   : > { %v351_v19 = vmul.f32 %v350_v18, %v348_v17 }
  0xd9   : > { %v352_v20 = vxor.u32 2147483648, %v351_v19 }
  0xdb   : > { %v353_v21 = vsel %vm270_vm7, %v352_v20, %v351_v19 }
  0xdc   : > { %v356_v23 = vsel %vm269_vm8, %v750_v6, %v353_v21 }
  0xdd   : > { %562 = vcosq.f32 %v356_v23 }
  0xde   : > { %564 = vsinq.f32 %v356_v23 }
  0xe7   : > { %v563_v27 = vpop.eup %562 }
  0xe8   : > { %v565_v28 = vpop.eup %564  ;;  %v367_v11 = vxor.u32 2147483648, %v563_v27 }
  0xe9   : > { %v364_v29 = vxor.u32 2147483648, %v565_v28 }
  0xea   : > { %v368_v30 = vsel %vm366_vm9, %v367_v11, %v565_v28 }
  0xeb   : > { %v365_v32 = vsel %vm363_vm10, %v563_v27, %v364_v29 }
  0xec   : > { %v369_v33 = vsel %vm362_vm11, %v365_v32, %v368_v30 }
  0xed   : > { %v370_v34 = vsel %vm360_vm12, nan, %v369_v33 }
  0xee   : > { %v372_v35 = vadd.f32 %v371_v31, %v370_v34 }
  0xf0   : > { %v373_v36 = vpack.c.bf16 %v372_v35, %v372_v35 }
  0xf2   : > { %375 = vst.msk [vmem:[%s231_s26] sm:$0xf] %vm374_vm13, %v373_v36 }
  0xf3   : > { %579 = shalt.err (!%p576_p5)
}
  0xf4   : > { %s580_s11 = scalar_lea.hbm %s781_s6, 64  ;;  %s584_s14 = scalar_lea.hbm %s832_s4, 128 }
  0xf5   : > { %p581_p6 = scmp.ne.s32.totalorder %s781_s6, %s580_s11  ;;  %p585_p10 = scmp.lt.u32.totalorder %s781_s6, %s832_s4 }
  0xf6   : > { %p586_p11 = scmp.lt.u32.totalorder %s584_s14, %s580_s11  ;;  %p588_p13 = scmp.lt.u32.totalorder %s580_s11, %s781_s6 }
  0xf7   : > { %p582_p7 = pnand %p581_p6, %p719_p4 }
  0xf8   : > { %p587_p12 = por %p586_p11, %p585_p10 }
  0xf9   : > { %p583_p9 = pneg %p582_p7 }
  0xfa   : > { %p589_p0 = por %p588_p13, %p587_p12 }
  0xfc   : > { %p590_p1 = pnand %p589_p0, %p583_p9 }
  0xfe   : > { %593 = shalt.err (!%p590_p1)
}
  0xff   : > { %499 = dma.vmem_to_hbm [thread:$0]  (%p719_p4), %s783_s29, 64, %s781_s6, %s377_s7  }
 0x100 PF: > { %p505_p2 = scmp.ge.s32.totalorder %s644_s20, 2  ;;  %s403_s24 = sand.u32 1, %s624_s15  }
 0x101   : > { %s404_s26 = scalar_lea.sflag [#allocation3], %s403_s24 }
 0x102   : > { %p502_p3 = pnand %p505_p2, %p726_p8 }
 0x104   : > { %619 = dma.done.wait (!%p502_p3), %s404_s26, 64  }
 0x105   : > { %621 = vsyncadd (!%p502_p3), %s404_s26, 4294967232  ;;  %s17_s20 = sadd.s32 1, %s644_s20   ;;  %s835_s15 = smov %s628_s16 }
 0x106   : > { %p14_p5 = scmp.ge.s32.totalorder %s17_s20, 4   ;;  %s836_s16 = smov %s632_s17 }
 0x107   : > { %s837_s17 = smov %s732_s28  ;;  %s838_s18 = smov %s640_s19 }
 0x108   : > { %s839_s19 = smov %s841_s23  ;;  %16 = sbr.rel (!%p14_p5) target bundleno = 4 (0x4), region = 74 }
 0x10f   :  { %409 = vsyncpa [#allocation3], 1 }
 0x110   :  { %411 = vsyncpa [#allocation3 + $0x1], 1 }

</bundles_post_ra>
